<compile_context>
chip_gen: v6e
topology: v6e:2x2x1
jax: 0.10.0
libtpu: 0.0.40
codegen_flags: <defaults>
</compile_context>

<pallas_src>
import jax
import jax.numpy as jnp
from jax.experimental import pallas as pl
from jax.experimental.pallas import tpu as pltpu


def _round_up(x, m):
    return ((x + m - 1) // m) * m


def _vmem_capacity_bytes():
    """Best-effort per-core VMEM capacity; conservative (v7x) fallback."""
    try:
        info = pltpu.get_tpu_info()
        for name in ("vmem_capacity_bytes", "vmem_bytes", "vmem_size_bytes"):
            v = getattr(info, name, None)
            if v:
                return int(v)
    except Exception:
        pass
    return 64 * 1024 * 1024  # v7x per-TensorCore VMEM (safe lower bound)


# -----------------------------------------------------------------------------
# Kernel A: W1 fully resident in VMEM -> one MXU pass per batch tile, no
# accumulator scratch, fused bias+ReLU+fc2+softmax epilogue.
# -----------------------------------------------------------------------------
def _mlp_kernel_resident(x_ref, w1_ref, b1_ref, w2_ref, b2_ref, o_ref):
    h = jnp.maximum(
        jnp.dot(x_ref[...], w1_ref[...], preferred_element_type=jnp.float32)
        + b1_ref[...], 0.0)
    # TODO(synk): training-mode dropout (pltpu.prng_random_bits mask); nn.Dropout
    # is identity in eval/inference mode.
    logits = jnp.dot(h.astype(jnp.bfloat16), w2_ref[...],
                     preferred_element_type=jnp.float32) + b2_ref[...]
    m = jnp.max(logits, axis=1, keepdims=True)
    e = jnp.exp(logits - m)
    d = jnp.sum(e, axis=1, keepdims=True)
    r = pl.reciprocal(d, approx=True)     # EUP slot
    r = r * (2.0 - d * r)                 # one Newton step -> near-exact softmax
    o_ref[...] = e * r


# -----------------------------------------------------------------------------
# Kernel B: K-tiled fc1 reduction with a f32 VMEM accumulator (used when W1 is
# too large for residency, e.g. big models on v7x's 64 MiB VMEM).
# -----------------------------------------------------------------------------
def _mlp_kernel_ktiled(x_ref, w1_ref, b1_ref, w2_ref, b2_ref, o_ref, acc_ref):
    k = pl.program_id(1)
    p = jnp.dot(x_ref[...], w1_ref[...], preferred_element_type=jnp.float32)

    @pl.when(k == 0)
    def _first():
        acc_ref[...] = p          # direct write: no zero-init + add on step 0

    @pl.when(k > 0)
    def _accum():
        acc_ref[...] += p

    @pl.when(k == pl.num_programs(1) - 1)
    def _epilogue():
        h = jnp.maximum(acc_ref[...] + b1_ref[...], 0.0)
        # TODO(synk): training-mode dropout; identity in eval mode.
        logits = jnp.dot(h.astype(jnp.bfloat16), w2_ref[...],
                         preferred_element_type=jnp.float32) + b2_ref[...]
        m = jnp.max(logits, axis=1, keepdims=True)
        e = jnp.exp(logits - m)
        d = jnp.sum(e, axis=1, keepdims=True)
        r = pl.reciprocal(d, approx=True)
        r = r * (2.0 - d * r)
        o_ref[...] = e * r


# -----------------------------------------------------------------------------
# One-time parameter preparation (hoisted out of the per-call path).
# -----------------------------------------------------------------------------
def prepare_params(params, *, tb=256, tk=512, vmem_budget_bytes=None,
                   force_ktiled=False):
    """Cast/pad weights once and pick the fc1 tiling plan for this chip."""
    w1 = jnp.asarray(params["w1"])
    b1 = jnp.asarray(params["b1"]).reshape(1, -1)
    w2 = jnp.asarray(params["w2"])
    b2 = jnp.asarray(params["b2"]).reshape(1, -1)
    emb = jnp.asarray(params["embedding"]).astype(jnp.bfloat16)  # row 0 == 0

    d_in, H = w1.shape
    O = w2.shape[1]
    Hp = _round_up(H, 128)
    Op = _round_up(O, 128)

    cap = _vmem_capacity_bytes() if vmem_budget_bytes is None else int(vmem_budget_bytes)
    budget = int(0.6 * cap)  # headroom for double-buffering / compiler scratch

    def resident_bytes(tb_):
        return (d_in * Hp * 2 + Hp * Op * 2          # W1, W2 (bf16, resident)
                + 2 * tb_ * d_in * 2                 # x tile, double-buffered
                + 2 * tb_ * Op * 4                   # out tile, double-buffered
                + Hp * 4 + Op * 4)                   # biases

    resident = (not force_ktiled) and resident_bytes(tb) <= budget

    if resident:
        Dp = d_in
        tk_eff = d_in
    else:
        tk_eff = max(128, min(_round_up(tk, 128), _round_up(d_in, 128)))

        def ktiled_bytes(tk_):
            return (2 * tb * tk_ * 2 + 2 * tk_ * Hp * 2   # x tile + W1 slab (dbl-buf)
                    + Hp * Op * 2 + tb * Hp * 4           # W2 resident + f32 acc
                    + 2 * tb * Op * 4 + Hp * 4 + Op * 4)

        while tk_eff > 128 and ktiled_bytes(tk_eff) > budget:
            tk_eff = max(128, (tk_eff // 2 // 128) * 128)
        Dp = _round_up(d_in, tk_eff)

    w1p = jnp.zeros((Dp, Hp), jnp.bfloat16).at[:d_in, :H].set(w1.astype(jnp.bfloat16))
    w2p = jnp.zeros((Hp, Op), jnp.bfloat16).at[:H, :O].set(w2.astype(jnp.bfloat16))
    b1p = jnp.zeros((1, Hp), jnp.float32).at[:, :H].set(b1.astype(jnp.float32))
    # Padded output lanes carry a huge negative bias -> exp() underflows to 0.
    # Must stay f32 (would overflow if ever cast to bf16).
    b2p = jnp.full((1, Op), -1e30, jnp.float32).at[:, :O].set(b2.astype(jnp.float32))

    plan = dict(D_in=d_in, Dp=Dp, H=H, Hp=Hp, O=O, Op=Op,
                tb=tb, tk=tk_eff, resident=resident,
                vmem_limit=int(min(cap, max(32 * 1024 * 1024, int(0.85 * cap)))))
    return {"embedding": emb, "w1p": w1p, "b1p": b1p, "w2p": w2p, "b2p": b2p,
            "plan": plan}


# -----------------------------------------------------------------------------
# Pallas call wrapper: out = softmax(relu(x @ W1 + b1) @ W2 + b2, axis=1)
# -----------------------------------------------------------------------------
def mlp_softmax(xp, prep, tb):
    """xp: (Bp, Dp) bf16, already padded. Returns (Bp, Op) f32 probabilities."""
    plan = prep["plan"]
    Bp, Dp = xp.shape
    Hp, Op = plan["Hp"], plan["Op"]

    if plan["resident"]:
        return pl.pallas_call(
            _mlp_kernel_resident,
            out_shape=jax.ShapeDtypeStruct((Bp, Op), jnp.float32),
            grid_spec=pltpu.PrefetchScalarGridSpec(
                num_scalar_prefetch=0,
                grid=(Bp // tb,),
                in_specs=[
                    pl.BlockSpec((tb, Dp), lambda i: (i, 0)),    # x tile (streamed)
                    pl.BlockSpec((Dp, Hp), lambda i: (0, 0)),    # W1 (resident)
                    pl.BlockSpec((1, Hp), lambda i: (0, 0)),     # b1
                    pl.BlockSpec((Hp, Op), lambda i: (0, 0)),    # W2 (resident)
                    pl.BlockSpec((1, Op), lambda i: (0, 0)),     # b2
                ],
                out_specs=pl.BlockSpec((tb, Op), lambda i: (i, 0)),
            ),
            compiler_params=pltpu.CompilerParams(
                dimension_semantics=("parallel",),
                vmem_limit_bytes=plan["vmem_limit"]),
        )(xp, prep["w1p"], prep["b1p"], prep["w2p"], prep["b2p"])

    tk = plan["tk"]
    return pl.pallas_call(
        _mlp_kernel_ktiled,
        out_shape=jax.ShapeDtypeStruct((Bp, Op), jnp.float32),
        grid_spec=pltpu.PrefetchScalarGridSpec(
            num_scalar_prefetch=0,
            grid=(Bp // tb, Dp // tk),
            in_specs=[
                pl.BlockSpec((tb, tk), lambda i, k: (i, k)),     # x tile
                pl.BlockSpec((tk, Hp), lambda i, k: (k, 0)),     # W1 k-slab
                pl.BlockSpec((1, Hp), lambda i, k: (0, 0)),      # b1 (resident)
                pl.BlockSpec((Hp, Op), lambda i, k: (0, 0)),     # W2 (resident)
                pl.BlockSpec((1, Op), lambda i, k: (0, 0)),      # b2 (resident)
            ],
            out_specs=pl.BlockSpec((tb, Op), lambda i, k: (i, 0)),
            scratch_shapes=[pltpu.VMEM((tb, Hp), jnp.float32)],  # fc1 accumulator
        ),
        compiler_params=pltpu.CompilerParams(
            dimension_semantics=("parallel", "arbitrary"),
            vmem_limit_bytes=plan["vmem_limit"]),
    )(xp, prep["w1p"], prep["b1p"], prep["w2p"], prep["b2p"])


# -----------------------------------------------------------------------------
# Full forward pass (embedding gather in JAX glue, dense path in Pallas).
# -----------------------------------------------------------------------------
def neural_network_forward(text, prep):
    """text: (B, 2*max_length) int32 token ids. Returns (B, output_dim) f32."""
    plan = prep["plan"]
    emb = prep["embedding"]                        # (vocab, E) bf16, row 0 == 0
    B, L2 = text.shape
    E = emb.shape[1]
    d_in, Dp = plan["D_in"], plan["Dp"]
    assert L2 * E == d_in

    # Batch tile: multiple of 16 (bf16 min sublane tile); aim for >=2 tiles so
    # the "parallel" batch axis can shard across v7x's two TensorCores.
    tb = max(16, min(plan["tb"], _round_up(B, 16)))
    Bp0 = _round_up(B, 16)
    if Bp0 // tb < 2 and Bp0 >= 32:
        tb = _round_up(Bp0 // 2, 16)
    Bp = _round_up(B, tb)

    # Pad the token ids instead of the activation slab: extra rows / positions
    # use id 0 (padding_idx=0 -> zero embedding row), so the gather directly
    # emits the padded slab and no separate HBM pad copy is made.
    pad_d = Dp - d_in
    ids = text.astype(jnp.int32)
    if pad_d and pad_d % E == 0:
        ids = jnp.pad(ids, ((0, Bp - B), (0, pad_d // E)))
        x = jnp.take(emb, ids, axis=0).reshape(Bp, Dp)
    else:
        ids = jnp.pad(ids, ((0, Bp - B), (0, 0)))
        x = jnp.take(emb, ids, axis=0).reshape(Bp, d_in)
        if pad_d:
            x = jnp.pad(x, ((0, 0), (0, pad_d)))
    # TODO(synk): fuse this gather into the Pallas kernel (scalar-prefetched ids
    # + in-kernel row gather / per-row DMA) to avoid materializing x in HBM.

    out = mlp_softmax(x, prep, tb)
    return out[:B, :plan["O"]]


# -----------------------------------------------------------------------------
# Pure-JAX reference (same bf16-input / f32-accumulate recipe) and init.
# -----------------------------------------------------------------------------
def reference_forward(text, params):
    emb = params["embedding"].astype(jnp.bfloat16)
    x = jnp.take(emb, text, axis=0).reshape(text.shape[0], -1)
    h = jnp.dot(x, params["w1"].astype(jnp.bfloat16),
                preferred_element_type=jnp.float32) + params["b1"]
    h = jnp.maximum(h, 0.0)
    logits = jnp.dot(h.astype(jnp.bfloat16), params["w2"].astype(jnp.bfloat16),
                     preferred_element_type=jnp.float32) + params["b2"]
    return jax.nn.softmax(logits, axis=1)


def init_params(key, vocab_size, embedding_dim, hidden_dim, output_dim, max_length):
    k_emb, k_w1, k_b1, k_w2, k_b2 = jax.random.split(key, 5)
    d_in = 2 * max_length * embedding_dim
    emb = jax.random.normal(k_emb, (vocab_size, embedding_dim), jnp.float32) * 0.1
    emb = emb.at[0].set(0.0)                         # padding_idx=0 -> zero row
    # PyTorch nn.Linear stores weight as (out, in); we keep (in, out) and use x @ W.
    w1 = jax.random.normal(k_w1, (d_in, hidden_dim), jnp.float32) / jnp.sqrt(d_in)
    b1 = jax.random.normal(k_b1, (1, hidden_dim), jnp.float32) * 0.01
    w2 = jax.random.normal(k_w2, (hidden_dim, output_dim), jnp.float32) / jnp.sqrt(hidden_dim)
    b2 = jax.random.normal(k_b2, (1, output_dim), jnp.float32) * 0.01
    return {"embedding": emb, "w1": w1, "b1": b1, "w2": w2, "b2": b2}


if __name__ == "__main__":
    # Small, module-consistent shapes. fc1 in-features = 2*16*8 = 256.
    vocab_size = 32
    embedding_dim = 8
    max_length = 16
    hidden_dim = 128
    output_dim = 16          # padded to 128 lanes inside the kernel
    batch = 16

    key = jax.random.PRNGKey(0)
    k_params, k_text = jax.random.split(key)
    params = init_params(k_params, vocab_size, embedding_dim,
                         hidden_dim, output_dim, max_length)
    text = jax.random.randint(k_text, (batch, 2 * max_length), 0, vocab_size,
                              dtype=jnp.int32)

    ref = reference_forward(text, params)

    # Path 1: fully-resident W1 (expected choice at these shapes on all chips).
    prep_res = prepare_params(params)
    fwd_res = jax.jit(lambda t: neural_network_forward(t, prep_res))
    out = jax.block_until_ready(fwd_res(text))
    assert out.shape == (batch, output_dim)
    row_sums = jnp.sum(out, axis=1)
    assert bool(jnp.all(jnp.abs(row_sums - 1.0) < 1e-3)), row_sums
    assert bool(jnp.max(jnp.abs(out - ref)) < 3e-3), jnp.max(jnp.abs(out - ref))

    # Path 2: K-tiled accumulator path (forced) so the large-W1 / v7x codepath
    # is also compiled and checked.
    prep_kt = prepare_params(params, tk=128, force_ktiled=True)
    fwd_kt = jax.jit(lambda t: neural_network_forward(t, prep_kt))
    out_kt = jax.block_until_ready(fwd_kt(text))
    assert out_kt.shape == (batch, output_dim)
    assert bool(jnp.max(jnp.abs(out_kt - ref)) < 3e-3), jnp.max(jnp.abs(out_kt - ref))

    print("KERNEL_OK")
</pallas_src>

<mosaic_0001>
module attributes {stable_mosaic.version = 11 : i64} {
  func.func @_mlp_kernel_resident(%arg0: i32, %arg1: memref<16x256xbf16, #tpu.memory_space<vmem>>, %arg2: memref<256x128xbf16, #tpu.memory_space<vmem>>, %arg3: memref<1x128xf32, #tpu.memory_space<vmem>>, %arg4: memref<128x128xbf16, #tpu.memory_space<vmem>>, %arg5: memref<1x128xf32, #tpu.memory_space<vmem>>, %arg6: memref<16x128xf32, #tpu.memory_space<vmem>>) attributes {dimension_semantics = [#tpu.dimension_semantics<parallel>], iteration_bounds = array<i64: 1>, scalar_prefetch = 0 : i64, scratch_operands = 0 : i64, tpu.core_type = #tpu.core_type<tc>, window_params = [{transform_indices = @transform_0, window_bounds = array<i64: 16, 256>}, {pipeline_mode = #tpu.pipeline_mode<synchronous>, transform_indices = @transform_1, window_bounds = array<i64: 256, 128>}, {pipeline_mode = #tpu.pipeline_mode<synchronous>, transform_indices = @transform_2, window_bounds = array<i64: 1, 128>}, {pipeline_mode = #tpu.pipeline_mode<synchronous>, transform_indices = @transform_3, window_bounds = array<i64: 128, 128>}, {pipeline_mode = #tpu.pipeline_mode<synchronous>, transform_indices = @transform_4, window_bounds = array<i64: 1, 128>}, {transform_indices = @transform_5, window_bounds = array<i64: 16, 128>}]} {
    %c0 = arith.constant 0 : index
    %c0_0 = arith.constant 0 : index
    %0 = vector.load %arg1[%c0, %c0_0] : memref<16x256xbf16, #tpu.memory_space<vmem>>, vector<16x256xbf16>
    %c0_1 = arith.constant 0 : index
    %c0_2 = arith.constant 0 : index
    %1 = vector.load %arg2[%c0_1, %c0_2] : memref<256x128xbf16, #tpu.memory_space<vmem>>, vector<256x128xbf16>
    %cst = arith.constant dense<0.000000e+00> : vector<16x128xf32>
    %2 = tpu.matmul %0, %1, %cst {dimension_numbers = #tpu.dot_dimension_numbers<[1], [0], [0], [1], [0, 0, 1, 1], [], []>} : vector<16x256xbf16>, vector<256x128xbf16>, vector<16x128xf32> -> vector<16x128xf32>
    %c0_3 = arith.constant 0 : index
    %c0_4 = arith.constant 0 : index
    %3 = vector.load %arg3[%c0_3, %c0_4] : memref<1x128xf32, #tpu.memory_space<vmem>>, vector<1x128xf32>
    %4 = vector.broadcast %3 : vector<1x128xf32> to vector<16x128xf32>
    %5 = arith.addf %2, %4 : vector<16x128xf32>
    %cst_5 = arith.constant 0.000000e+00 : f32
    %6 = vector.broadcast %cst_5 : f32 to vector<16x128xf32>
    %7 = arith.maximumf %5, %6 : vector<16x128xf32>
    %8 = arith.truncf %7 : vector<16x128xf32> to vector<16x128xbf16>
    %c0_6 = arith.constant 0 : index
    %c0_7 = arith.constant 0 : index
    %9 = vector.load %arg4[%c0_6, %c0_7] : memref<128x128xbf16, #tpu.memory_space<vmem>>, vector<128x128xbf16>
    %cst_8 = arith.constant dense<0.000000e+00> : vector<16x128xf32>
    %10 = tpu.matmul %8, %9, %cst_8 {dimension_numbers = #tpu.dot_dimension_numbers<[1], [0], [0], [1], [0, 0, 1, 1], [], []>} : vector<16x128xbf16>, vector<128x128xbf16>, vector<16x128xf32> -> vector<16x128xf32>
    %c0_9 = arith.constant 0 : index
    %c0_10 = arith.constant 0 : index
    %11 = vector.load %arg5[%c0_9, %c0_10] : memref<1x128xf32, #tpu.memory_space<vmem>>, vector<1x128xf32>
    %12 = vector.broadcast %11 : vector<1x128xf32> to vector<16x128xf32>
    %13 = arith.addf %10, %12 : vector<16x128xf32>
    %cst_11 = arith.constant dense<0xFF800000> : vector<16xf32>
    %14 = vector.multi_reduction <maximumf>, %13, %cst_11 [1] : vector<16x128xf32> to vector<16xf32>
    %15 = vector.shape_cast %14 : vector<16xf32> to vector<16x1xf32>
    %16 = vector.broadcast %15 : vector<16x1xf32> to vector<16x128xf32>
    %17 = arith.subf %13, %16 : vector<16x128xf32>
    %18 = math.exp %17 : vector<16x128xf32>
    %cst_12 = arith.constant dense<0.000000e+00> : vector<16xf32>
    %19 = vector.multi_reduction <add>, %18, %cst_12 [1] : vector<16x128xf32> to vector<16xf32>
    %20 = vector.shape_cast %19 : vector<16xf32> to vector<16x1xf32>
    %21 = tpu.reciprocal %20 {approx = true} : vector<16x1xf32> -> vector<16x1xf32>
    %22 = arith.mulf %20, %21 : vector<16x1xf32>
    %cst_13 = arith.constant 2.000000e+00 : f32
    %23 = vector.broadcast %cst_13 : f32 to vector<16x1xf32>
    %24 = arith.subf %23, %22 : vector<16x1xf32>
    %25 = arith.mulf %21, %24 : vector<16x1xf32>
    %26 = vector.broadcast %25 : vector<16x1xf32> to vector<16x128xf32>
    %27 = arith.mulf %18, %26 : vector<16x128xf32>
    %c0_14 = arith.constant 0 : index
    %c0_15 = arith.constant 0 : index
    %28 = vector.load %arg6[%c0_14, %c0_15] : memref<16x128xf32, #tpu.memory_space<vmem>>, vector<16x128xf32>
    tpu.vector_store %arg6[%c0_14, %c0_15], %27 {strides = array<i32>} : memref<16x128xf32, #tpu.memory_space<vmem>>, vector<16x128xf32>,
    return
  }
  func.func @transform_0(%arg0: i32) -> (i32, i32) {
    %c0_i32 = arith.constant 0 : i32
    %c0_i32_0 = arith.constant 0 : i32
    return %arg0, %c0_i32 : i32, i32
  }
  func.func @transform_1(%arg0: i32) -> (i32, i32) {
    %c0_i32 = arith.constant 0 : i32
    %c0_i32_0 = arith.constant 0 : i32
    %c0_i32_1 = arith.constant 0 : i32
    return %c0_i32, %c0_i32_0 : i32, i32
  }
  func.func @transform_2(%arg0: i32) -> (i32, i32) {
    %c0_i32 = arith.constant 0 : i32
    %c0_i32_0 = arith.constant 0 : i32
    %c0_i32_1 = arith.constant 0 : i32
    return %c0_i32, %c0_i32_0 : i32, i32
  }
  func.func @transform_3(%arg0: i32) -> (i32, i32) {
    %c0_i32 = arith.constant 0 : i32
    %c0_i32_0 = arith.constant 0 : i32
    %c0_i32_1 = arith.constant 0 : i32
    return %c0_i32, %c0_i32_0 : i32, i32
  }
  func.func @transform_4(%arg0: i32) -> (i32, i32) {
    %c0_i32 = arith.constant 0 : i32
    %c0_i32_0 = arith.constant 0 : i32
    %c0_i32_1 = arith.constant 0 : i32
    return %c0_i32, %c0_i32_0 : i32, i32
  }
  func.func @transform_5(%arg0: i32) -> (i32, i32) {
    %c0_i32 = arith.constant 0 : i32
    %c0_i32_0 = arith.constant 0 : i32
    return %arg0, %c0_i32 : i32, i32
  }
}

</mosaic_0001>

<bundles_post_ra>
// kernel: _lambda_.1
= control target key start
LH: loop header
LB: loop body
LE: loop exit
PB: predicated region body
PF: predicated region fallthrough
CT: control target
= control target key end

     0   :  { %v508_v2 = vmov 0.0   ;;  %s630_s0 = inlined_call_operand.vmem [shape: bf16[16,256], index: 0, kind: input, shape index: {}]   ;;  %s631_s1 = inlined_call_operand.vmem [shape: bf16[256,128], index: 1, kind: input, shape index: {}]   ;;  %s632_s2 = inlined_call_operand.vmem [shape: f32[1,128], index: 2, kind: input, shape index: {}]   ;;  %s633_s3 = inlined_call_operand.vmem [shape: bf16[128,128], index: 3, kind: input, shape index: {}]   ;;  %s634_s4 = inlined_call_operand.vmem [shape: f32[1,128], index: 4, kind: input, shape index: {}]   ;;  %s635_s5 = inlined_call_operand.hbm [shape: f32[16,128], index: 5, kind: output, shape index: {}]  }
   0x1   :  { %v451_v0 = vld [vmem:[%s631_s1 + $0x78] sm:$0xff]   ;;  %426 = vmatprep.subr.bf16.mxu1 %v508_v2  ;;  %v453_v3 = vld [vmem:[%s631_s1 + $0x70] sm:$0xff]   ;;  %v455_v5 = vld [vmem:[%s631_s1 + $0x68] sm:$0xff]  }
   0x2   :  { %v452_v1 = vld [vmem:[%s631_s1 + $0x38] sm:$0xff]   ;;  %395 = vmatprep.subr.bf16.mxu0 %v451_v0  ;;  %v454_v4 = vld [vmem:[%s631_s1 + $0x30] sm:$0xff]   ;;  %v456_v6 = vld [vmem:[%s631_s1 + $0x28] sm:$0xff]  }
   0x3   :  { %396 = vmatpush3.bf16.msra.mxu0 %v452_v1  ;;  %v457_v7 = vld [vmem:[%s631_s1 + $0x60] sm:$0xff]   ;;  %v459_v9 = vld [vmem:[%s631_s1 + $0x58] sm:$0xff]   ;;  %v461_v11 = vld [vmem:[%s631_s1 + $0x50] sm:$0xff]  }
   0x4   :  { %397 = vmatprep.subr.bf16.mxu0 %v453_v3  ;;  %v458_v8 = vld [vmem:[%s631_s1 + $0x20] sm:$0xff]   ;;  %v460_v10 = vld [vmem:[%s631_s1 + $0x18] sm:$0xff]   ;;  %v462_v12 = vld [vmem:[%s631_s1 + $0x10] sm:$0xff]  }
   0x5   :  { %v469_v13 = vld [vmem:[%s630_s0 + $0x4] ss:$8 sps:$4 sm:$0xff]   ;;  %v470_v14 = vld [vmem:[%s633_s3 + $0x38] sm:$0xff]   ;;  %v471_v16 = vld [vmem:[%s633_s3 + $0x30] sm:$0xff]  }
   0x6   :  { %v463_v15 = vld [vmem:[%s631_s1 + $0x48] sm:$0xff]   ;;  %201 = vmatprep.mubr.bf16.mxu0 %v469_v13  ;;  %427 = vmatpush3.bf16.msra.mxu1 %v470_v14  ;;  %v465_v18 = vld [vmem:[%s631_s1 + $0x40] sm:$0xff]  }
   0x7   :  { %398 = vmatpush3.bf16.msra.mxu0 %v454_v4  ;;  %v464_v17 = vld [vmem:[%s631_s1 + $0x8] sm:$0xff]   ;;  %428 = vmatprep.subr.bf16.mxu1 %v508_v2 }
   0x8   :  { %399 = vmatprep.subr.bf16.mxu0 %v455_v5  ;;  %v472_v19 = vld [vmem:[%s633_s3 + $0x28] sm:$0xff]  }
   0xa   :  { %429 = vmatpush3.bf16.msra.mxu1 %v471_v16 }
   0xb   :  { %400 = vmatpush3.bf16.msra.mxu0 %v456_v6 }
   0xc   :  { %401 = vmatprep.subr.bf16.mxu0 %v457_v7 }
   0xf   :  { %402 = vmatpush3.bf16.msra.mxu0 %v458_v8 }
  0x10   :  { %403 = vmatprep.subr.bf16.mxu0 %v459_v9 }
  0x13   :  { %404 = vmatpush3.bf16.msra.mxu0 %v460_v10 }
  0x14   :  { %405 = vmatprep.subr.bf16.mxu0 %v461_v11 }
  0x17   :  { %406 = vmatpush3.bf16.msra.mxu0 %v462_v12 }
  0x18   :  { %407 = vmatprep.subr.bf16.mxu0 %v463_v15 }
  0x19   :  { %10 = vsyncpa [#allocation3], 0  ;;  %430 = vmatprep.subr.bf16.mxu1 %v508_v2  ;;  %v466_v20 = vld [vmem:[%s631_s1] sm:$0xff]   ;;  %v474_v23 = vld [vmem:[%s633_s3 + $0x18] sm:$0xff]   ;;  %vm509_vm0 = vmmov 0  }
  0x1a   :  { %431 = vmatpush3.bf16.msra.mxu1 %v472_v19  ;;  %v473_v21 = vld [vmem:[%s633_s3 + $0x20] sm:$0xff]   ;;  %v475_v24 = vld [vmem:[%s633_s3 + $0x10] sm:$0xff]   ;;  %v476_v25 = vld [vmem:[%s633_s3 + $0x8] sm:$0xff]   ;;  %442 = vmatprep.mubr.msk.bf16.mxu1 %vm509_vm0, %v508_v2 }
  0x1b   :  { %408 = vmatpush3.bf16.msra.mxu0 %v464_v17  ;;  %432 = vmatprep.subr.bf16.mxu1 %v508_v2  ;;  %v467_v22 = vld [vmem:[%s630_s0] ss:$8 sps:$4 sm:$0xff]  }
  0x1c   :  { %409 = vmatprep.subr.bf16.mxu0 %v465_v18  ;;  %v477_v26 = vld [vmem:[%s633_s3] sm:$0xff]  }
  0x1d   :  { %v367_v30 = vld [vmem:[%s632_s2] ss:$0 sm:$0xff]  ;;  %s510_s2 = smov [#allocation2]  }
  0x1e   :  { %433 = vmatpush3.bf16.msra.mxu1 %v473_v21  ;;  %v386_v39 = vld [vmem:[%s634_s4] ss:$0 sm:$0xff]  ;;  %s356_s4 = sshll.u32 %s510_s2, 4  ;;  %s357_s4 = int_to_ptr.vmem [resolvable:$true] %s356_s4 }
  0x1f   :  { %410 = vmatpush3.bf16.msra.mxu0 %v466_v20  ;;  %434 = vmatprep.subr.bf16.mxu1 %v508_v2  ;;  %s486_s21 = scalar_lea.vmem %s357_s4, 256  ;;  %p491_p1 = scmp.lt.s32.totalorder %s357_s4, %s357_s4 }
  0x20   :  { %p487_p0 = scmp.ne.s32.totalorder %s357_s4, %s486_s21  ;;  %p492_p2 = scmp.lt.s32.totalorder %s486_s21, %s486_s21 }
  0x22   :  { %202 = vmatmul.mubr.bf16.vlgmr.msra.gmra.mxu0 %v467_v22  ;;  %435 = vmatpush3.bf16.msra.mxu1 %v474_v23  ;;  %p493_p3 = por %p492_p2, %p491_p1 }
  0x23   :  { %436 = vmatprep.subr.bf16.mxu1 %v508_v2 }
  0x24   :  { %p494_p4 = pnand %p493_p3, %p487_p0 }
  0x26   :  { %437 = vmatpush3.bf16.msra.mxu1 %v475_v24 }
  0x27   :  { %438 = vmatprep.subr.bf16.mxu1 %v508_v2 }
  0x2a   :  { %439 = vmatpush3.bf16.msra.mxu1 %v476_v25 }
  0x2b   :  { %440 = vmatprep.subr.bf16.mxu1 %v508_v2 }
  0x2e   :  { %441 = vmatpush3.bf16.msra.mxu1 %v477_v26 }
  0xe2   :  { %v411_v27 = vpop.f32.mrf.mxu0 }
  0xe4   :  { %v412_v28 = vpop.f32.mrf.mxu0 }
  0xe5   :  { %v413_v29 = vadd.f32 %v412_v28, %v411_v27 }
  0xe6   :  { %v414_v31 = vpop.f32.mrf.mxu0 }
  0xe7   :  { %v204_v33 = vadd.f32 %v413_v29, %v367_v30 }
  0xe8   :  { %v415_v32 = vpop.f32.mrf.mxu0 }
  0xe9   :  { %v416_v34 = vadd.f32 %v415_v32, %v414_v31  ;;  %v210_v36 = vmax.f32 %v204_v33, 0.0 }
  0xeb   :  { %v207_v35 = vadd.f32 %v416_v34, %v367_v30 }
  0xed   :  { %v211_v37 = vmax.f32 %v207_v35, 0.0 }
  0xef   :  { %v212_v38 = vpack.c.bf16 %v211_v37, %v210_v36 }
  0xf1   :  { %443 = vmatmul.mubr.bf16.vlgmr.msra.gmra.mxu1 %v212_v38 }
 0x1b1   :  { %v318_v40 = vpop.f32.mrf.mxu1 }
 0x1b2   :  { %v319_v41 = vadd.f32 %v386_v39, %v318_v40 }
 0x1b3   :  { %v444_v42 = vpop.f32.mrf.mxu1 }
 0x1b4   :  { %325 = vmax.xlane.f32.xlu0 %v319_v41 }
 0x1b5   :  { %v321_v43 = vpop.f32.mrf.mxu1 }
 0x1b6   :  { %v322_v44 = vadd.f32 %v386_v39, %v321_v43 }
 0x1b7   :  { %v445_v45 = vpop.f32.mrf.mxu1 }
 0x1b8   :  { %327 = vmax.xlane.f32.xlu0 %v322_v44 }
 0x23d   :  { %v326_v46 = vpop.xlane.xlu0 %325 }
 0x23e   :  { %v329_v47 = vsub.f32 %v319_v41, %v326_v46 }
 0x240   :  { %v331_v48 = vmul.f32 1.442695, %v329_v47 }
 0x241   :  { %v328_v49 = vpop.xlane.xlu0 %327 }
 0x242   :  { %478 = vpow2.f32 %v331_v48  ;;  %v330_v50 = vsub.f32 %v322_v44, %v328_v49 }
 0x244   :  { %v333_v51 = vmul.f32 1.442695, %v330_v50 }
 0x246   :  { %480 = vpow2.f32 %v333_v51 }
 0x24f   :  { %v479_v52 = vpop.eup %478 }
 0x250   :  { %335 = vadd.xlane.f32.xlu1 %v479_v52 }
 0x253   :  { %v481_v53 = vpop.eup %480 }
 0x254   :  { %337 = vadd.xlane.f32.xlu1 %v481_v53 }
 0x2d9   :  { %v336_v54 = vpop.xlane.xlu1 %335 }
 0x2da   :  { %482 = vrcp.f32 %v336_v54 }
 0x2dd   :  { %v338_v55 = vpop.xlane.xlu1 %337 }
 0x2de   :  { %484 = vrcp.f32 %v338_v55 }
 0x2e7   :  { %v483_v56 = vpop.eup %482 }
 0x2e8   :  { %v341_v57 = vmul.f32 %v483_v56, %v336_v54 }
 0x2ea   :  { %v343_v58 = vsub.f32 2.0, %v341_v57 }
 0x2eb   :  { %v485_v59 = vpop.eup %484 }
 0x2ec   :  { %v345_v60 = vmul.f32 %v483_v56, %v343_v58  ;;  %v342_v61 = vmul.f32 %v485_v59, %v338_v55 }
 0x2ee   :  { %v347_v62 = vmul.f32 %v479_v52, %v345_v60  ;;  %v344_v63 = vsub.f32 2.0, %v342_v61 }
 0x2f0   :  { %349 = vst [vmem:[#allocation2] sm:$0xff] %v347_v62  ;;  %v346_v0 = vmul.f32 %v485_v59, %v344_v63 }
 0x2f2   :  { %v348_v1 = vmul.f32 %v481_v53, %v346_v0 }
 0x2f4   :  { %350 = vst [vmem:[#allocation2 + $0x8] sm:$0xff] %v348_v1 }
 0x2f5   :  { %497 = shalt.err (!%p494_p4)
}
 0x2f6   :  { %s511_s22 = smov 128   ;;  %s512_s23 = smov 8  }
 0x2f7   :  { %362 = dma.vmem_to_hbm [thread:$0]  %s357_s4, 256, %s635_s5, [#allocation3], %s511_s22, %s511_s22, %s512_s23  }
 0x2f8   :  { %506 = dma.done.wait [#allocation3], 256  }
 0x2f9   :  { %507 = vsyncadd [#allocation3], 4294967040 }
 0x2fa   :  { %366 = vsyncpa [#allocation3], 1 }

</bundles_post_ra>
